<compile_context>
chip_gen: v5e
topology: v5e:2x2
jax: 0.10.0
libtpu: 0.0.40
codegen_flags: <defaults>
</compile_context>

<pallas_src>
import functools

import jax
import jax.numpy as jnp
from jax.experimental import pallas as pl
from jax.experimental.pallas import tpu as pltpu

_MIB = 1024 * 1024


def _round_up(x, m):
    return ((x + m - 1) // m) * m


def _cdiv(a, b):
    return (a + b - 1) // b


def _vmem_capacity_bytes():
    """Physical VMEM per TensorCore (generation-aware, conservative fallback)."""
    try:
        cap = getattr(pltpu.get_tpu_info(), "vmem_capacity_bytes", None)
        if cap:
            return int(cap)
    except Exception:
        pass
    return 64 * _MIB  # v7x-sized fallback: safe on every generation


def _bf16_epilogue_ok():
    """bf16 exp/scale only on chips with bf16 VPU/EUP (v6e, v7x); f32 on v5e & older."""
    try:
        kind = jax.devices()[0].device_kind.lower()
    except Exception:
        return False
    return not any(tag in kind for tag in ("v2", "v3", "v4", "v5"))


# ---------------------------------------------------------------------------
# Kernels
# ---------------------------------------------------------------------------

def _classifier_kernel(x_ref, w_ref, b_ref, o_ref, *, compute_dtype, exact_recip):
    """Whole-vocab-resident path: logits = x @ W^T + b, fused row softmax."""
    x = x_ref[...].astype(w_ref.dtype)  # f32 -> bf16 cast hidden under the MXU
    logits = jnp.dot(x, w_ref[...], preferred_element_type=jnp.float32) + b_ref[...]
    m = jnp.max(logits, axis=-1, keepdims=True)
    # Keep (logits - m) in f32 so -1e30 padded-vocab columns underflow cleanly to 0
    # even when the exp runs in bf16.
    e = jnp.exp((logits - m).astype(compute_dtype))
    denom = jnp.sum(e.astype(jnp.float32), axis=-1, keepdims=True)
    inv = (1.0 / denom) if exact_recip else pl.reciprocal(denom, approx=True)
    o_ref[...] = (e * inv.astype(e.dtype)).astype(o_ref.dtype)


def _classifier_kernel_vtiled(x_ref, w_ref, b_ref, o_ref, logits_ref, *,
                              compute_dtype, exact_recip, tv):
    """Vocab-tiled path: stream (D, TV) weight tiles, keep f32 logits resident in
    VMEM scratch, softmax finalize on the last vocab tile."""
    j = pl.program_id(1)
    x = x_ref[...].astype(w_ref.dtype)
    logits_ref[j] = (
        jnp.dot(x, w_ref[...], preferred_element_type=jnp.float32) + b_ref[...]
    )

    @pl.when(j == pl.num_programs(1) - 1)
    def _finalize():
        logits = logits_ref[...]                               # (nj, TB, TV) f32
        m = jnp.max(jnp.max(logits, axis=-1, keepdims=True), axis=0, keepdims=True)
        e = jnp.exp((logits - m).astype(compute_dtype))
        denom = jnp.sum(jnp.sum(e.astype(jnp.float32), axis=-1, keepdims=True),
                        axis=0, keepdims=True)
        inv = (1.0 / denom) if exact_recip else pl.reciprocal(denom, approx=True)
        p = e * inv.astype(e.dtype)                            # (nj, TB, TV)
        nj = logits_ref.shape[0]
        for jj in range(nj):  # static unroll -> lane-aligned 128-wide static stores
            o_ref[:, jj * tv:(jj + 1) * tv] = p[jj].astype(o_ref.dtype)


# ---------------------------------------------------------------------------
# Parameter prep (one-time, outside the hot path)
# ---------------------------------------------------------------------------

def prepare_classifier_params(weight, bias):
    """weight: [V, D] f32 (nn.Linear layout), bias: [V] f32.

    Returns (W^T as bf16 [D, Vp], bias f32 [1, Vp], V) with Vp a multiple of 128;
    padded vocab columns get bias = -1e30 so their softmax probability is 0.
    """
    V, D = weight.shape
    Vp = _round_up(V, 128)
    w_t = weight.T.astype(jnp.bfloat16)                    # [D, V]
    b = bias.astype(jnp.float32)
    if Vp != V:
        w_t = jnp.pad(w_t, ((0, 0), (0, Vp - V)))
        b = jnp.pad(b, (0, Vp - V), constant_values=-1e30)
    return w_t, b.reshape(1, Vp), V


# ---------------------------------------------------------------------------
# Forward
# ---------------------------------------------------------------------------

def _pick_tb(batch, per_row_bytes, fixed_bytes, budget_bytes):
    """Largest batch tile (multiple of 16, <= 256) that fits the VMEM budget, with
    >= ~4 tiles when the batch allows (pipelining + 2-TC sharding on v7x)."""
    avail = max(budget_bytes - fixed_bytes, 0)
    tb = int(avail // max(per_row_bytes, 1)) // 16 * 16
    tb = max(16, min(256, tb))
    if batch > 16:
        tb = min(tb, max(16, _round_up(_cdiv(batch, 4), 16)))
    tb = min(tb, _round_up(batch, 8))   # never exceed the (8-rounded) batch
    return max(tb, 8)


def content_classifier_forward(x, w_t, bias_2d, vocab_size, *,
                               out_dtype=jnp.bfloat16,
                               exact_reciprocal=False,
                               force_vocab_tile=None):
    """x: [1, B, D] f32. Returns [B, vocab_size] softmax probabilities (out_dtype)."""
    _, B, D = x.shape
    Dw, Vp = w_t.shape
    assert Dw == D, (Dw, D)
    x2d = x.reshape(B, D)  # squeeze(0); bf16 cast happens inside the kernel

    out_bytes = jnp.dtype(out_dtype).itemsize
    compute_dtype = jnp.bfloat16 if _bf16_epilogue_ok() else jnp.float32
    cb = jnp.dtype(compute_dtype).itemsize

    vmem_cap = _vmem_capacity_bytes()
    budget = vmem_cap - 12 * _MIB            # headroom for Mosaic internals

    weight_resident = D * Vp * 2 + Vp * 4    # bf16 weight + f32 bias, single-buffered
    use_vtiled = (force_vocab_tile is not None) or (weight_resident > budget // 2)

    if not use_vtiled:
        # Per batch-row VMEM: x tiles (f32, double-buffered) + in-kernel bf16 copy,
        # double-buffered out tiles, and the logits / e / e_f32 intermediates.
        per_row = (2 * D * 4 + D * 2
                   + 2 * Vp * out_bytes
                   + Vp * (4 + cb + 4))
        tb = _pick_tb(B, per_row, weight_resident, budget)
        grid = (_cdiv(B, tb),)
        need = weight_resident + tb * per_row
        vmem_limit = int(min(max(need * 1.25, 16 * _MIB), vmem_cap - 8 * _MIB))

        kern = functools.partial(_classifier_kernel,
                                 compute_dtype=compute_dtype,
                                 exact_recip=exact_reciprocal)
        out = pl.pallas_call(
            kern,
            out_shape=jax.ShapeDtypeStruct((B, Vp), out_dtype),
            grid=grid,
            in_specs=[
                pl.BlockSpec((tb, D), lambda i: (i, 0)),     # activations, tiled
                # Whole weight/bias resident in VMEM for all grid steps, copied once
                # (single buffer -- not part of the double-buffered pipeline).
                pl.BlockSpec(memory_space=pltpu.MemorySpace.VMEM),
                pl.BlockSpec(memory_space=pltpu.MemorySpace.VMEM),
            ],
            out_specs=pl.BlockSpec((tb, Vp), lambda i: (i, 0)),
            compiler_params=pltpu.CompilerParams(
                dimension_semantics=("parallel",),
                vmem_limit_bytes=vmem_limit,
            ),
        )(x2d, w_t, bias_2d)
    else:
        # Vocab-tiled path: weight streamed in (D, TV) tiles; f32 logits resident in
        # VMEM scratch for the current batch tile; softmax finalize on the last tile.
        if force_vocab_tile is not None:
            tv = int(force_vocab_tile)
            assert tv % 128 == 0 and Vp % tv == 0, (tv, Vp)
        else:
            tv = 128
            for cand in (2048, 1024, 512, 256, 128):
                if Vp % cand == 0:
                    tv = cand
                    break
        nj = Vp // tv

        per_row = (2 * D * 4 + D * 2
                   + 2 * Vp * out_bytes
                   + Vp * 4                    # resident f32 logits scratch
                   + Vp * (4 + cb + cb))       # finalize intermediates
        fixed = 2 * D * tv * 2 + 2 * tv * 4    # double-buffered weight/bias tiles
        tb = _pick_tb(B, per_row, fixed, budget)
        grid = (_cdiv(B, tb), nj)
        need = fixed + tb * per_row
        vmem_limit = int(min(max(need * 1.25, 16 * _MIB), vmem_cap - 8 * _MIB))

        kern = functools.partial(_classifier_kernel_vtiled,
                                 compute_dtype=compute_dtype,
                                 exact_recip=exact_reciprocal,
                                 tv=tv)
        out = pl.pallas_call(
            kern,
            out_shape=jax.ShapeDtypeStruct((B, Vp), out_dtype),
            grid=grid,
            in_specs=[
                pl.BlockSpec((tb, D), lambda i, j: (i, 0)),   # activations
                pl.BlockSpec((D, tv), lambda i, j: (0, j)),   # weight tile stream
                pl.BlockSpec((1, tv), lambda i, j: (0, j)),   # bias tile stream
            ],
            out_specs=pl.BlockSpec((tb, Vp), lambda i, j: (i, 0)),
            scratch_shapes=[pltpu.VMEM((nj, tb, tv), jnp.float32)],
            compiler_params=pltpu.CompilerParams(
                dimension_semantics=("parallel", "arbitrary"),
                vmem_limit_bytes=vmem_limit,
            ),
        )(x2d, w_t, bias_2d)

    if Vp != vocab_size:
        out = out[:, :vocab_size]
    return out


def _reference(x, weight, bias):
    logits = jnp.einsum("obd,vd->obv", x, weight) + bias
    return jax.nn.softmax(logits, axis=2)[0]


def _make_params(key, B, D, V):
    kx, kw, kb = jax.random.split(key, 3)
    x = jax.random.normal(kx, (1, B, D), dtype=jnp.float32)
    bound = 1.0 / (D ** 0.5)
    weight = jax.random.uniform(kw, (V, D), minval=-bound, maxval=bound,
                                dtype=jnp.float32)
    bias = jax.random.uniform(kb, (V,), minval=-bound, maxval=bound,
                              dtype=jnp.float32)
    return x, weight, bias


if __name__ == "__main__":
    key = jax.random.PRNGKey(0)
    k1, k2 = jax.random.split(key)

    # --- Primary test: whole-vocab-resident path ([1, B, D] -> [B, V]) -------
    B, D, V = 8, 32, 128
    x, weight, bias = _make_params(k1, B, D, V)
    w_t, b2d, vocab = prepare_classifier_params(weight, bias)
    fwd = jax.jit(functools.partial(content_classifier_forward, vocab_size=vocab))
    out = jax.block_until_ready(fwd(x, w_t, b2d))
    ref = _reference(x, weight, bias)
    assert out.shape == (B, V), out.shape
    out_f32 = out.astype(jnp.float32)
    # bf16 matmul inputs / bf16 output / approx reciprocal => relaxed tolerances.
    assert jnp.allclose(out_f32, ref, atol=2e-2, rtol=2e-2), "mismatch vs reference"
    assert jnp.allclose(jnp.sum(out_f32, axis=-1), 1.0, atol=2e-2), "rows must sum to ~1"

    # --- Secondary test: vocab-tiled streaming path, ragged batch tile, V padding ---
    B2, D2, V2 = 12, 32, 200
    x2, weight2, bias2 = _make_params(k2, B2, D2, V2)
    w_t2, b2d2, vocab2 = prepare_classifier_params(weight2, bias2)
    fwd2 = jax.jit(functools.partial(content_classifier_forward, vocab_size=vocab2,
                                     force_vocab_tile=128))
    out2 = jax.block_until_ready(fwd2(x2, w_t2, b2d2))
    ref2 = _reference(x2, weight2, bias2)
    assert out2.shape == (B2, V2), out2.shape
    out2_f32 = out2.astype(jnp.float32)
    assert jnp.allclose(out2_f32, ref2, atol=2e-2, rtol=2e-2), "vtiled mismatch vs reference"
    assert jnp.allclose(jnp.sum(out2_f32, axis=-1), 1.0, atol=2e-2), "vtiled rows must sum to ~1"

    print("KERNEL_OK")
</pallas_src>

<mosaic_0001>
module attributes {stable_mosaic.version = 11 : i64} {
  func.func @_classifier_kernel(%arg0: i32, %arg1: memref<8x32xf32, #tpu.memory_space<vmem>>, %arg2: memref<32x128xbf16, #tpu.memory_space<vmem>>, %arg3: memref<1x128xf32, #tpu.memory_space<vmem>>, %arg4: memref<8x128xbf16, #tpu.memory_space<vmem>>) attributes {dimension_semantics = [#tpu.dimension_semantics<parallel>], iteration_bounds = array<i64: 1>, scalar_prefetch = 0 : i64, scratch_operands = 0 : i64, tpu.core_type = #tpu.core_type<tc>, window_params = [{transform_indices = @transform_0, window_bounds = array<i64: 8, 32>}, {pipeline_mode = #tpu.pipeline_mode<synchronous>, transform_indices = @transform_1, window_bounds = array<i64: 32, 128>}, {pipeline_mode = #tpu.pipeline_mode<synchronous>, transform_indices = @transform_2, window_bounds = array<i64: 1, 128>}, {transform_indices = @transform_3, window_bounds = array<i64: 8, 128>}]} {
    %c0 = arith.constant 0 : index
    %c0_0 = arith.constant 0 : index
    %0 = vector.load %arg1[%c0, %c0_0] : memref<8x32xf32, #tpu.memory_space<vmem>>, vector<8x32xf32>
    %1 = arith.truncf %0 : vector<8x32xf32> to vector<8x32xbf16>
    %c0_1 = arith.constant 0 : index
    %c0_2 = arith.constant 0 : index
    %2 = vector.load %arg2[%c0_1, %c0_2] : memref<32x128xbf16, #tpu.memory_space<vmem>>, vector<32x128xbf16>
    %cst = arith.constant dense<0.000000e+00> : vector<8x128xf32>
    %3 = tpu.matmul %1, %2, %cst {dimension_numbers = #tpu.dot_dimension_numbers<[1], [0], [0], [1], [0, 0, 1, 1], [], []>} : vector<8x32xbf16>, vector<32x128xbf16>, vector<8x128xf32> -> vector<8x128xf32>
    %c0_3 = arith.constant 0 : index
    %c0_4 = arith.constant 0 : index
    %4 = vector.load %arg3[%c0_3, %c0_4] : memref<1x128xf32, #tpu.memory_space<vmem>>, vector<1x128xf32>
    %5 = vector.broadcast %4 : vector<1x128xf32> to vector<8x128xf32>
    %6 = arith.addf %3, %5 : vector<8x128xf32>
    %cst_5 = arith.constant dense<0xFF800000> : vector<8xf32>
    %7 = vector.multi_reduction <maximumf>, %6, %cst_5 [1] : vector<8x128xf32> to vector<8xf32>
    %8 = vector.shape_cast %7 : vector<8xf32> to vector<8x1xf32>
    %9 = vector.broadcast %8 : vector<8x1xf32> to vector<8x128xf32>
    %10 = arith.subf %6, %9 : vector<8x128xf32>
    %11 = arith.truncf %10 : vector<8x128xf32> to vector<8x128xbf16>
    %12 = math.exp %11 : vector<8x128xbf16>
    %13 = arith.extf %12 : vector<8x128xbf16> to vector<8x128xf32>
    %cst_6 = arith.constant dense<0.000000e+00> : vector<8xf32>
    %14 = vector.multi_reduction <add>, %13, %cst_6 [1] : vector<8x128xf32> to vector<8xf32>
    %15 = vector.shape_cast %14 : vector<8xf32> to vector<8x1xf32>
    %16 = tpu.reciprocal %15 {approx = true} : vector<8x1xf32> -> vector<8x1xf32>
    %17 = arith.truncf %16 : vector<8x1xf32> to vector<8x1xbf16>
    %18 = vector.broadcast %17 : vector<8x1xbf16> to vector<8x128xbf16>
    %19 = arith.mulf %12, %18 : vector<8x128xbf16>
    %c0_7 = arith.constant 0 : index
    %c0_8 = arith.constant 0 : index
    %20 = vector.load %arg4[%c0_7, %c0_8] : memref<8x128xbf16, #tpu.memory_space<vmem>>, vector<8x128xbf16>
    tpu.vector_store %arg4[%c0_7, %c0_8], %19 {strides = array<i32>} : memref<8x128xbf16, #tpu.memory_space<vmem>>, vector<8x128xbf16>,
    return
  }
  func.func @transform_0(%arg0: i32) -> (i32, i32) {
    %c0_i32 = arith.constant 0 : i32
    %c0_i32_0 = arith.constant 0 : i32
    return %arg0, %c0_i32 : i32, i32
  }
  func.func @transform_1(%arg0: i32) -> (i32, i32) {
    %c0_i32 = arith.constant 0 : i32
    %c0_i32_0 = arith.constant 0 : i32
    %c0_i32_1 = arith.constant 0 : i32
    return %c0_i32, %c0_i32_0 : i32, i32
  }
  func.func @transform_2(%arg0: i32) -> (i32, i32) {
    %c0_i32 = arith.constant 0 : i32
    %c0_i32_0 = arith.constant 0 : i32
    %c0_i32_1 = arith.constant 0 : i32
    return %c0_i32, %c0_i32_0 : i32, i32
  }
  func.func @transform_3(%arg0: i32) -> (i32, i32) {
    %c0_i32 = arith.constant 0 : i32
    %c0_i32_0 = arith.constant 0 : i32
    return %arg0, %c0_i32 : i32, i32
  }
}

</mosaic_0001>

<bundles_post_ra>
// kernel: content_classifier_forward.1
= control target key start
LH: loop header
LB: loop body
LE: loop exit
PB: predicated region body
PF: predicated region fallthrough
CT: control target
= control target key end

     0   :  { %8 = vsyncpa [#allocation3], 0  ;;  %s256_s0 = inlined_call_operand.hbm [shape: f32[8,32], index: 0, kind: input, shape index: {}]   ;;  %s257_s1 = inlined_call_operand.hbm [shape: bf16[32,128], index: 1, kind: input, shape index: {}]   ;;  %s258_s2 = inlined_call_operand.vmem [shape: f32[1,128], index: 2, kind: input, shape index: {}]   ;;  %s259_s3 = inlined_call_operand.hbm [shape: bf16[8,128], index: 3, kind: output, shape index: {}]  }
   0x1   :  { %9 = vsyncpa [#allocation6], 0 }
   0x2   :  { %10 = vsyncpa [#allocation4], 0  ;;  %s16_s14 = sshll.u32 %s256_s0, 4  ;;  %s219_s15 = smov [#allocation2]   ;;  %s17_s14 = int_to_ptr.hbm [resolvable:$true] %s16_s14 }
   0x3   :  { %s18_s16 = sshll.u32 %s219_s15, 4  ;;  %s26_s19 = sshll.u32 %s257_s1, 4  ;;  %s19_s16 = int_to_ptr.vmem [resolvable:$true] %s18_s16  ;;  %s27_s19 = int_to_ptr.hbm [resolvable:$true] %s26_s19 }
   0x4   :  { %21 = dma.hbm_to_vmem [thread:$0]  %s17_s14, 128, %s19_s16, [#allocation3]  }
   0x5   :  { %s220_s20 = smov [#allocation5]   ;;  %s221_s22 = smov 64  }
   0x6   :  { %s28_s21 = sshll.u32 %s220_s20, 4  ;;  %s222_s23 = smov 4   ;;  %s29_s21 = int_to_ptr.vmem [resolvable:$true] %s28_s21 }
   0x7   :  { %34 = dma.hbm_to_vmem [thread:$0]  %s27_s19, 256, %s29_s21, [#allocation6], %s221_s22, %s221_s22, %s222_s23  }
   0x8   :  { %213 = dma.done.wait [#allocation3], 128  }
   0x9   :  { %214 = vsyncadd [#allocation3], 4294967168 }
   0xa   :  { %215 = dma.done.wait [#allocation6], 256  }
   0xb   :  { %216 = vsyncadd [#allocation6], 4294967040  ;;  %v130_v0 = vld [vmem:[#allocation5 + $0x8] sm:$0xff]  ;;  %v129_v1 = vld [vmem:[#allocation5] sm:$0xff]  ;;  %vm68_vm0 = vcmask 261120   ;;  %s109_s27 = sshll.u32 %s259_s3, 4  ;;  %s110_s27 = int_to_ptr.hbm [resolvable:$true] %s109_s27 }
   0xc   :  { %78 = vmatpush.bf16.msra.mxu0 %v130_v0  ;;  %v46_v2 = vld [vmem:[#allocation2] sm:$0xff] }
   0xd   :  { %v47_v3 = vpack.c.bf16 %v46_v2, %v46_v2  ;;  %v136_v4 = vld [vmem:[%s258_s2] ss:$0 sm:$0xff]  ;;  %s223_s2 = smov [#allocation7]  }
   0xe   :  { %s107_s24 = sshll.u32 %s223_s2, 4  ;;  %s108_s24 = int_to_ptr.vmem [resolvable:$true] %s107_s24 }
  0x10   :  { %79 = vmatpush.bf16.msra.mxu0 %v129_v1 }
  0x13   :  { %128 = vmatmul.msk.bf16.vlgmr.msra.gmra.mxu0 %vm68_vm0, %v47_v3 }
  0x90   :  { %v81_v5 = vpop.f32.mrf.mxu0 }
  0x91   :  { %v82_v6 = vadd.f32 %v136_v4, %v81_v5 }
  0x93   :  { %85 = vmax.xlane.f32.xlu0 %v82_v6 }
  0x98   :  { %v83_v7 = vpop.f32.mrf.mxu0 }
 0x106   :  { %v86_v8 = vpop.xlane.xlu0 %85 }
 0x107   :  { %v87_v9 = vsub.f32 %v82_v6, %v86_v8 }
 0x109   :  { %v88_v10 = vpack.c.bf16 %v87_v9, %v87_v9 }
 0x10b   :  { %v89_v11 = vunpack.c.l.bf16 %v88_v10 }
 0x10d   :  { %v90_v12 = vmul.f32 1.442695, %v89_v11 }
 0x10f   :  { %137 = vpow2.f32 %v90_v12 }
 0x115   :  { %v138_v13 = vpop.eup %137 }
 0x116   :  { %v92_v14 = vpack.c.bf16 %v138_v13, %v138_v13 }
 0x118   :  { %v93_v15 = vunpack.c.l.bf16 %v92_v14 }
 0x11a   :  { %94 = vadd.xlane.f32.xlu0 %v93_v15 }
 0x18d   :  { %v95_v16 = vpop.xlane.xlu0 %94 }
 0x18e   :  { %139 = vrcp.f32 %v95_v16 }
 0x194   :  { %v140_v17 = vpop.eup %139 }
 0x195   :  { %v97_v18 = vpack.c.bf16 %v140_v17, %v140_v17 }
 0x197   :  { %v98_v19 = vunpack.c.l.bf16 %v97_v18 }
 0x199   :  { %v99_v20 = vmul.f32 %v98_v19, %v93_v15 }
 0x19b   :  { %v100_v21 = vpack.c.bf16 %v99_v20, %v99_v20 }
 0x19d   :  { %101 = vst [vmem:[#allocation7] sm:$0xf] %v100_v21 }
 0x19e   :  { %112 = dma.vmem_to_hbm [thread:$0]  %s108_s24, 64, %s110_s27, [#allocation4]  }
 0x19f   :  { %217 = dma.done.wait [#allocation4], 64  }
 0x1a0   :  { %218 = vsyncadd [#allocation4], 4294967232 }
 0x1a1   :  { %117 = vsyncpa [#allocation3], 1 }
 0x1a2   :  { %118 = vsyncpa [#allocation6], 1 }
 0x1a3   :  { %119 = vsyncpa [#allocation4], 1 }

</bundles_post_ra>
